<compile_context>
chip_gen: v5e
topology: v5e:2x2
jax: 0.10.0
libtpu: 0.0.40
codegen_flags: <defaults>
</compile_context>

<pallas_src>
import functools

import jax
import jax.numpy as jnp
from jax.experimental import pallas as pl
from jax.experimental.pallas import tpu as pltpu


# ----------------------------------------------------------------------------
# helpers
# ----------------------------------------------------------------------------

def _round_up(x, m):
    return (x + m - 1) // m * m


def _choose_tm(m):
    """Large pixel tiles (up to 4096 lanes) to amortize the ~0.35us/step grid
    overhead, but keep >= 2 blocks when possible so both TensorCores get work
    under dimension_semantics=("parallel",).  Must stay a multiple of 128
    (lane-dim block constraint)."""
    tm = 4096
    while tm > 128 and (m + tm - 1) // tm < 2:
        tm //= 2
    return tm


# ----------------------------------------------------------------------------
# shared fused conv1 -> LeakyReLU -> conv2 (pixels on lanes)
# ----------------------------------------------------------------------------

def _conv12(x, w1, b1, w2_bf):
    """x: (Cin, tm) f32, w1: (C1, Cin) f32, b1: (C1, 1) f32, w2_bf: (C2, C1) bf16.
    Returns y2: (C2, tm) f32.  Used by BOTH stages so the recomputed y2 in
    stage 2 is bit-identical to the values the BN statistics were taken from."""
    cin = x.shape[0]
    if cin <= 8:
        # Tiny-K 1x1 conv: f32 broadcast-MAC on the VPU (an MXU matmul would run
        # at Cin/256 utilization; also avoids extra bf16 casts on v5e).
        h = b1 + w1[:, 0:1] * x[0:1, :]
        for c in range(1, cin):
            h = h + w1[:, c:c + 1] * x[c:c + 1, :]
    else:
        h = jnp.dot(w1.astype(jnp.bfloat16), x.astype(jnp.bfloat16),
                    preferred_element_type=jnp.float32) + b1
    h = jnp.where(h >= 0, h, 0.2 * h)                       # LeakyReLU(0.2)
    # conv2 (no bias): bf16 MXU matmul (M=C2, K=C1, N=tm), f32 accumulation.
    return jnp.dot(w2_bf, h.astype(jnp.bfloat16),
                   preferred_element_type=jnp.float32)      # (C2, tm) f32


# ----------------------------------------------------------------------------
# Pallas kernels
# ----------------------------------------------------------------------------

def _disc_stage1_kernel(x_ref, w1_ref, b1_ref, w2_ref, ssum_ref, ssq_ref,
                        *, m_total, tm, mask_cols):
    """Fused conv1+LeakyReLU+conv2; emits only f32 BatchNorm partial stats
    (per-channel sum and sum-of-squares over this tile's valid pixels)."""
    y2 = _conv12(x_ref[...], w1_ref[...], b1_ref[...], w2_ref[...])
    if mask_cols:
        col = pl.program_id(0) * tm + jax.lax.broadcasted_iota(
            jnp.int32, (1, tm), 1)
        y2 = jnp.where(col < m_total, y2, 0.0)
    ssum_ref[...] = jnp.sum(y2, axis=1, keepdims=True)        # (C2, 1)
    ssq_ref[...] = jnp.sum(y2 * y2, axis=1, keepdims=True)    # (C2, 1)


def _disc_stage2_kernel(x_ref, w1_ref, b1_ref, w2_ref, scale_ref, shift_ref,
                        w3_ref, o_ref):
    """Recompute conv1+LeakyReLU+conv2 (bit-identical to stage 1), then fused
    BatchNorm affine (f32) -> LeakyReLU(0.2) -> conv3 (Cout=1)."""
    y2 = _conv12(x_ref[...], w1_ref[...], b1_ref[...], w2_ref[...])
    y = y2 * scale_ref[...] + shift_ref[...]                  # BN affine, f32
    y = jnp.where(y >= 0, y, 0.2 * y)                         # LeakyReLU(0.2)
    # conv3 to a single output channel: f32 multiply + sublane reduction ->
    # lane-dense (1, tm) store (avoids a 1-lane masked-store output).
    o_ref[...] = jnp.sum(y * w3_ref[...], axis=0, keepdims=True)


# ----------------------------------------------------------------------------
# forward pass
# ----------------------------------------------------------------------------

def pixel_discriminator_forward(params, x_nchw, eps=1e-5):
    N, Cin, H, W = x_nchw.shape
    M = N * H * W

    # NCHW -> (Cin, M): pixels on lanes.  Cheap outer-dim permute (each (c, n)
    # plane stays a contiguous H*W run); x tiles become lane-dense (Cin, tm).
    x2d = jnp.transpose(x_nchw, (1, 0, 2, 3)).reshape(Cin, M).astype(jnp.float32)

    w1 = params["w1"]            # (C1, Cin, 1, 1), bias=True
    b1 = params["b1"]            # (C1,)
    w2 = params["w2"]            # (C2, C1, 1, 1), bias=False (BatchNorm norm layer)
    gamma, beta = params["gamma"], params["beta"]
    w3 = params["w3"]            # (1, C2, 1, 1), bias=False
    C1, C2 = w1.shape[0], w2.shape[0]

    w1m = w1.reshape(C1, Cin).astype(jnp.float32)             # (C1, Cin)
    b1c = b1.reshape(C1, 1).astype(jnp.float32)               # (C1, 1)
    w2m = w2.reshape(C2, C1).astype(jnp.bfloat16)             # (C2, C1)
    w3c = w3.reshape(C2, 1).astype(jnp.float32)               # (C2, 1)

    tm = _choose_tm(M)
    Mp = _round_up(M, tm)
    mask_cols = Mp != M
    if mask_cols:
        x2d = jnp.pad(x2d, ((0, 0), (0, Mp - M)))
    G = Mp // tm

    cparams = pltpu.CompilerParams(
        dimension_semantics=("parallel",),
        vmem_limit_bytes=32 * 1024 * 1024)   # explicit (v5e default is 16 MiB)

    # ---- stage 1: conv1 + LeakyReLU + conv2 -> f32 BN partial stats only ----
    ssum_p, ssq_p = pl.pallas_call(
        functools.partial(_disc_stage1_kernel,
                          m_total=M, tm=tm, mask_cols=mask_cols),
        out_shape=(jax.ShapeDtypeStruct((G * C2, 1), jnp.float32),
                   jax.ShapeDtypeStruct((G * C2, 1), jnp.float32)),
        grid_spec=pltpu.PrefetchScalarGridSpec(
            num_scalar_prefetch=0,
            grid=(G,),
            in_specs=[pl.BlockSpec((Cin, tm), lambda i: (0, i)),
                      pl.BlockSpec((C1, Cin), lambda i: (0, 0)),
                      pl.BlockSpec((C1, 1), lambda i: (0, 0)),
                      pl.BlockSpec((C2, C1), lambda i: (0, 0))],
            out_specs=[pl.BlockSpec((C2, 1), lambda i: (i, 0)),
                       pl.BlockSpec((C2, 1), lambda i: (i, 0))]),
        compiler_params=cparams,
    )(x2d, w1m, b1c, w2m)

    # BatchNorm2d (training-mode batch statistics) from the f32 partial sums;
    # the tiny (G, C2) combine + scale/shift prep is plain JAX.
    ssum = jnp.sum(ssum_p.reshape(G, C2), axis=0)
    ssq = jnp.sum(ssq_p.reshape(G, C2), axis=0)
    mean = ssum / M
    var = jnp.maximum(ssq / M - mean * mean, 0.0)      # biased variance (PyTorch fwd)
    scale = (gamma / jnp.sqrt(var + eps)).astype(jnp.float32)
    shift = (beta - mean * scale).astype(jnp.float32)

    # ---- stage 2: recompute conv1/conv2 + BN affine + LeakyReLU + conv3 -----
    out = pl.pallas_call(
        _disc_stage2_kernel,
        out_shape=jax.ShapeDtypeStruct((1, Mp), jnp.float32),
        grid_spec=pltpu.PrefetchScalarGridSpec(
            num_scalar_prefetch=0,
            grid=(G,),
            in_specs=[pl.BlockSpec((Cin, tm), lambda i: (0, i)),
                      pl.BlockSpec((C1, Cin), lambda i: (0, 0)),
                      pl.BlockSpec((C1, 1), lambda i: (0, 0)),
                      pl.BlockSpec((C2, C1), lambda i: (0, 0)),
                      pl.BlockSpec((C2, 1), lambda i: (0, 0)),
                      pl.BlockSpec((C2, 1), lambda i: (0, 0)),
                      pl.BlockSpec((C2, 1), lambda i: (0, 0))],
            out_specs=pl.BlockSpec((1, tm), lambda i: (0, i))),
        compiler_params=cparams,
    )(x2d, w1m, b1c, w2m, scale.reshape(C2, 1), shift.reshape(C2, 1), w3c)

    out = out[0, :M]
    return out.reshape(N, H, W)[:, None, :, :]   # -> NCHW (N, 1, H, W)


# ----------------------------------------------------------------------------
# pure-JAX reference (f32, HIGHEST precision) for correctness checking
# ----------------------------------------------------------------------------

def pixel_discriminator_reference(params, x_nchw, eps=1e-5):
    hp = jax.lax.Precision.HIGHEST
    N, Cin, H, W = x_nchw.shape
    x = jnp.transpose(x_nchw, (0, 2, 3, 1)).reshape(-1, Cin).astype(jnp.float32)
    C1, C2 = params["w1"].shape[0], params["w2"].shape[0]
    w1m = params["w1"].reshape(C1, Cin).T
    w2m = params["w2"].reshape(C2, C1).T
    w3m = params["w3"].reshape(1, C2).T

    h = jnp.dot(x, w1m, precision=hp) + params["b1"]
    h = jnp.where(h >= 0, h, 0.2 * h)
    y2 = jnp.dot(h, w2m, precision=hp)
    mean = jnp.mean(y2, axis=0)
    var = jnp.var(y2, axis=0)
    y3 = (y2 - mean) / jnp.sqrt(var + eps) * params["gamma"] + params["beta"]
    y3 = jnp.where(y3 >= 0, y3, 0.2 * y3)
    out = jnp.dot(y3, w3m, precision=hp)
    return jnp.transpose(out.reshape(N, H, W, 1), (0, 3, 1, 2))


# ----------------------------------------------------------------------------
# main
# ----------------------------------------------------------------------------

if __name__ == "__main__":
    input_nc, ndf = 3, 64          # module defaults: ndf=64, norm=BatchNorm2d
    N, H, W = 2, 16, 16            # small test shapes

    key = jax.random.PRNGKey(0)
    k1, k2, k3, k4, kx = jax.random.split(key, 5)
    params = {
        "w1": 0.02 * jax.random.normal(k1, (ndf, input_nc, 1, 1), jnp.float32),
        "b1": 0.02 * jax.random.normal(k2, (ndf,), jnp.float32),
        "w2": 0.02 * jax.random.normal(k3, (ndf * 2, ndf, 1, 1), jnp.float32),
        "gamma": jnp.ones((ndf * 2,), jnp.float32),
        "beta": jnp.zeros((ndf * 2,), jnp.float32),
        "w3": 0.02 * jax.random.normal(k4, (1, ndf * 2, 1, 1), jnp.float32),
    }
    x = jax.random.normal(kx, (N, input_nc, H, W), jnp.float32)

    out = jax.block_until_ready(pixel_discriminator_forward(params, x))
    ref = jax.block_until_ready(pixel_discriminator_reference(params, x))

    assert out.shape == (N, 1, H, W), out.shape
    assert bool(jnp.all(jnp.isfinite(out)))
    max_err = float(jnp.max(jnp.abs(out - ref)))
    assert max_err < 5e-2, f"max abs error vs reference: {max_err}"
    print("KERNEL_OK")
</pallas_src>

<mosaic_0001>
module attributes {stable_mosaic.version = 11 : i64} {
  func.func @_disc_stage1_kernel(%arg0: i32, %arg1: memref<3x256xf32, #tpu.memory_space<vmem>>, %arg2: memref<64x3xf32, #tpu.memory_space<vmem>>, %arg3: memref<64x1xf32, #tpu.memory_space<vmem>>, %arg4: memref<128x64xbf16, #tpu.memory_space<vmem>>, %arg5: memref<128x1xf32, #tpu.memory_space<vmem>>, %arg6: memref<128x1xf32, #tpu.memory_space<vmem>>) attributes {dimension_semantics = [#tpu.dimension_semantics<parallel>], iteration_bounds = array<i64: 2>, scalar_prefetch = 0 : i64, scratch_operands = 0 : i64, tpu.core_type = #tpu.core_type<tc>, window_params = [{transform_indices = @transform_0, window_bounds = array<i64: 3, 256>}, {pipeline_mode = #tpu.pipeline_mode<synchronous>, transform_indices = @transform_1, window_bounds = array<i64: 64, 3>}, {pipeline_mode = #tpu.pipeline_mode<synchronous>, transform_indices = @transform_2, window_bounds = array<i64: 64, 1>}, {pipeline_mode = #tpu.pipeline_mode<synchronous>, transform_indices = @transform_3, window_bounds = array<i64: 128, 64>}, {transform_indices = @transform_4, window_bounds = array<i64: 128, 1>}, {transform_indices = @transform_5, window_bounds = array<i64: 128, 1>}]} {
    %c0 = arith.constant 0 : index
    %c0_0 = arith.constant 0 : index
    %0 = vector.load %arg1[%c0, %c0_0] : memref<3x256xf32, #tpu.memory_space<vmem>>, vector<3x256xf32>
    %c0_1 = arith.constant 0 : index
    %c0_2 = arith.constant 0 : index
    %1 = vector.load %arg2[%c0_1, %c0_2] : memref<64x3xf32, #tpu.memory_space<vmem>>, vector<64x3xf32>
    %c0_3 = arith.constant 0 : index
    %c0_4 = arith.constant 0 : index
    %2 = vector.load %arg3[%c0_3, %c0_4] : memref<64x1xf32, #tpu.memory_space<vmem>>, vector<64x1xf32>
    %c0_5 = arith.constant 0 : index
    %c0_6 = arith.constant 0 : index
    %3 = vector.load %arg4[%c0_5, %c0_6] : memref<128x64xbf16, #tpu.memory_space<vmem>>, vector<128x64xbf16>
    %4 = vector.extract_strided_slice %1 {offsets = [0, 0], sizes = [64, 1], strides = [1, 1]} : vector<64x3xf32> to vector<64x1xf32>
    %5 = vector.extract_strided_slice %0 {offsets = [0, 0], sizes = [1, 256], strides = [1, 1]} : vector<3x256xf32> to vector<1x256xf32>
    %6 = vector.broadcast %4 : vector<64x1xf32> to vector<64x256xf32>
    %7 = vector.broadcast %5 : vector<1x256xf32> to vector<64x256xf32>
    %8 = arith.mulf %6, %7 : vector<64x256xf32>
    %9 = vector.broadcast %2 : vector<64x1xf32> to vector<64x256xf32>
    %10 = arith.addf %9, %8 : vector<64x256xf32>
    %11 = vector.extract_strided_slice %1 {offsets = [0, 1], sizes = [64, 1], strides = [1, 1]} : vector<64x3xf32> to vector<64x1xf32>
    %12 = vector.extract_strided_slice %0 {offsets = [1, 0], sizes = [1, 256], strides = [1, 1]} : vector<3x256xf32> to vector<1x256xf32>
    %13 = vector.broadcast %11 : vector<64x1xf32> to vector<64x256xf32>
    %14 = vector.broadcast %12 : vector<1x256xf32> to vector<64x256xf32>
    %15 = arith.mulf %13, %14 : vector<64x256xf32>
    %16 = arith.addf %10, %15 : vector<64x256xf32>
    %17 = vector.extract_strided_slice %1 {offsets = [0, 2], sizes = [64, 1], strides = [1, 1]} : vector<64x3xf32> to vector<64x1xf32>
    %18 = vector.extract_strided_slice %0 {offsets = [2, 0], sizes = [1, 256], strides = [1, 1]} : vector<3x256xf32> to vector<1x256xf32>
    %19 = vector.broadcast %17 : vector<64x1xf32> to vector<64x256xf32>
    %20 = vector.broadcast %18 : vector<1x256xf32> to vector<64x256xf32>
    %21 = arith.mulf %19, %20 : vector<64x256xf32>
    %22 = arith.addf %16, %21 : vector<64x256xf32>
    %cst = arith.constant 0.000000e+00 : f32
    %23 = vector.broadcast %cst : f32 to vector<64x256xf32>
    %24 = arith.cmpf oge, %22, %23 : vector<64x256xf32>
    %cst_7 = arith.constant 2.000000e-01 : f32
    %25 = vector.broadcast %cst_7 : f32 to vector<64x256xf32>
    %26 = arith.mulf %25, %22 : vector<64x256xf32>
    %27 = arith.select %24, %22, %26 : vector<64x256xi1>, vector<64x256xf32>
    %28 = arith.truncf %27 : vector<64x256xf32> to vector<64x256xbf16>
    %cst_8 = arith.constant dense<0.000000e+00> : vector<128x256xf32>
    %29 = tpu.matmul %3, %28, %cst_8 {dimension_numbers = #tpu.dot_dimension_numbers<[1], [0], [0], [1], [0, 0, 1, 1], [], []>} : vector<128x64xbf16>, vector<64x256xbf16>, vector<128x256xf32> -> vector<128x256xf32>
    %cst_9 = arith.constant dense<0.000000e+00> : vector<128xf32>
    %30 = vector.multi_reduction <add>, %29, %cst_9 [1] : vector<128x256xf32> to vector<128xf32>
    %31 = vector.shape_cast %30 : vector<128xf32> to vector<128x1xf32>
    %c0_10 = arith.constant 0 : index
    %c0_11 = arith.constant 0 : index
    %32 = vector.load %arg5[%c0_10, %c0_11] : memref<128x1xf32, #tpu.memory_space<vmem>>, vector<128x1xf32>
    tpu.vector_store %arg5[%c0_10, %c0_11], %31 {strides = array<i32>} : memref<128x1xf32, #tpu.memory_space<vmem>>, vector<128x1xf32>,
    %33 = arith.mulf %29, %29 : vector<128x256xf32>
    %cst_12 = arith.constant dense<0.000000e+00> : vector<128xf32>
    %34 = vector.multi_reduction <add>, %33, %cst_12 [1] : vector<128x256xf32> to vector<128xf32>
    %35 = vector.shape_cast %34 : vector<128xf32> to vector<128x1xf32>
    %c0_13 = arith.constant 0 : index
    %c0_14 = arith.constant 0 : index
    %36 = vector.load %arg6[%c0_13, %c0_14] : memref<128x1xf32, #tpu.memory_space<vmem>>, vector<128x1xf32>
    tpu.vector_store %arg6[%c0_13, %c0_14], %35 {strides = array<i32>} : memref<128x1xf32, #tpu.memory_space<vmem>>, vector<128x1xf32>,
    return
  }
  func.func @transform_0(%arg0: i32) -> (i32, i32) {
    %c0_i32 = arith.constant 0 : i32
    %c0_i32_0 = arith.constant 0 : i32
    return %c0_i32, %arg0 : i32, i32
  }
  func.func @transform_1(%arg0: i32) -> (i32, i32) {
    %c0_i32 = arith.constant 0 : i32
    %c0_i32_0 = arith.constant 0 : i32
    %c0_i32_1 = arith.constant 0 : i32
    return %c0_i32, %c0_i32_0 : i32, i32
  }
  func.func @transform_2(%arg0: i32) -> (i32, i32) {
    %c0_i32 = arith.constant 0 : i32
    %c0_i32_0 = arith.constant 0 : i32
    %c0_i32_1 = arith.constant 0 : i32
    return %c0_i32, %c0_i32_0 : i32, i32
  }
  func.func @transform_3(%arg0: i32) -> (i32, i32) {
    %c0_i32 = arith.constant 0 : i32
    %c0_i32_0 = arith.constant 0 : i32
    %c0_i32_1 = arith.constant 0 : i32
    return %c0_i32, %c0_i32_0 : i32, i32
  }
  func.func @transform_4(%arg0: i32) -> (i32, i32) {
    %c0_i32 = arith.constant 0 : i32
    %c0_i32_0 = arith.constant 0 : i32
    return %arg0, %c0_i32 : i32, i32
  }
  func.func @transform_5(%arg0: i32) -> (i32, i32) {
    %c0_i32 = arith.constant 0 : i32
    %c0_i32_0 = arith.constant 0 : i32
    return %arg0, %c0_i32 : i32, i32
  }
}

</mosaic_0001>

<bundles_post_ra>
// kernel: tpu_custom_call.1
= control target key start
LH: loop header
LB: loop body
LE: loop exit
PB: predicated region body
PF: predicated region fallthrough
CT: control target
= control target key end

     0   :  { %s1154_s18 = smov 0   ;;  %s1409_s0 = inlined_call_operand.vmem [shape: f32[3,512], index: 0, kind: input, shape index: {}]   ;;  %s1410_s1 = inlined_call_operand.vmem [shape: f32[64,3], index: 1, kind: input, shape index: {}]   ;;  %s1411_s2 = inlined_call_operand.vmem [shape: f32[64,1], index: 2, kind: input, shape index: {}]   ;;  %s1412_s3 = inlined_call_operand.vmem [shape: bf16[128,64], index: 3, kind: input, shape index: {}]   ;;  %s1413_s4 = inlined_call_operand.vmem [shape: f32[256,1], index: 4, kind: output, shape index: {0}]   ;;  %s1414_s5 = inlined_call_operand.vmem [shape: f32[256,1], index: 5, kind: output, shape index: {1}]  }
   0x1 LB: > { %s1005_s19 = sadd.s32 4294967295, %s1119_s18   ;;  %p1009_p0 = scmp.ge.s32.totalorder %s1119_s18, 1  ;;  %s1119_s18 = sphi %s1154_s18, %s16_s18  }
   0x2   : > { %p191_p1 = scmp.lt.s32.totalorder %s1119_s18, 3 }
   0x4   : > { %p192_p2 = pnand %p1009_p0, %p191_p1 }
   0x5   : > { %s1010_s29 = sshll.u32 (!%p192_p2), %s1005_s19, 1  ;;  %s1012_s27 = sshll.u32 (!%p192_p2), %s1005_s19, 4 }
   0x6   : > { %195 = sbr.rel (%p192_p2) target bundleno = 569 (0x239), region = 36  ;;  %p225_p3 = scmp.lt.s32.totalorder (!%p192_p2), %s1010_s29, 3 }
   0x7   : > { %p231_p4 = scmp.lt.s32.totalorder (!%p192_p2), %s1012_s27, 31 }
   0xb   : > { %v258_v0 = vld [vmem:[%s1411_s2 + $0x30] sm:$0xff]  ;;  %v1121_v2 = vmov 0   ;;  %v1122_v3 = vmov 1   ;;  %v259_v4 = vld [vmem:[%s1411_s2 + $0x38] sm:$0xff]  ;;  %v249_v6 = vld [vmem:[%s1410_s1 + $0x28] sm:$0xff]  ;;  %v1123_v8 = vmov 2  }
   0xc   : > { %v250_v1 = vld [vmem:[%s1410_s1 + $0x30] sm:$0xff]  ;;  %1094 = vset.pattern.permute.xlu1 %v1121_v2  ;;  %1093 = vset.pattern.permute.xlu0 %v1121_v2  ;;  %v251_v5 = vld [vmem:[%s1410_s1 + $0x38] sm:$0xff]  ;;  %v248_v7 = vld [vmem:[%s1410_s1 + $0x20] sm:$0xff]  ;;  %s1416_s29 = smov (!%p225_p3, %s1010_s29), 3  ;;  %s1418_s27 = smov (!%p231_p4, %s1012_s27), 31 }
   0xd   : > { %371 = vperm.xlu1 %1094, %v258_v0   ;;  %308 = vperm.xlu0 %1093, %v250_v1   ;;  %v256_v9 = vld [vmem:[%s1411_s2 + $0x20] sm:$0xff]  ;;  %v246_v10 = vld [vmem:[%s1410_s1 + $0x10] sm:$0xff]  ;;  %v257_v11 = vld [vmem:[%s1411_s2 + $0x28] sm:$0xff]  ;;  %s1011_s30 = sshll.u32 %s1416_s29, 2  ;;  %s1013_s28 = sshll.u32 %s1418_s27, 3 }
   0xe   : > { %1095 = vset.pattern.permute.xlu2 %v1122_v3  ;;  %v255_v12 = vld [vmem:[%s1411_s2 + $0x18] sm:$0xff]  ;;  %v244_v13 = vld [vmem:[%s1410_s1] sm:$0xff]  ;;  %v254_v15 = vld [vmem:[%s1411_s2 + $0x10] sm:$0xff]  ;;  %s228_s8 = scalar_lea.vmem %s1409_s0, %s1011_s30  ;;  %s1335_s6 = scalar_lea.vmem %s1413_s4, %s1013_s28 }
   0xf   : > { %420 = vperm.xlu2 %1095, %v250_v1   ;;  %v247_v14 = vld [vmem:[%s1410_s1 + $0x18] sm:$0xff]  ;;  %v245_v16 = vld [vmem:[%s1410_s1 + $0x8] sm:$0xff]  ;;  %v252_v17 = vld [vmem:[%s1411_s2] sm:$0xff]  ;;  %s1342_s19 = scalar_lea.vmem %s1414_s5, %s1013_s28 }
  0x10   : > { %v253_v18 = vld [vmem:[%s1411_s2 + $0x8] sm:$0xff]  ;;  %v243_v27 = vld [vmem:[%s228_s8] sm:$0x77] }
  0x11   : > { %v317_v30 = vperm.slane %v243_v27, 0  ;;  %v318_v31 = vperm.slane %v243_v27, 4  ;;  %v427_v32 = vperm.slane %v243_v27, 1  ;;  %v428_v35 = vperm.slane %v243_v27, 5 }
  0x12   : > { %v497_v40 = vperm.slane %v243_v27, 2  ;;  %v498_v43 = vperm.slane %v243_v27, 6 }
  0x13   : > { %v1217_v33 = vperm.slane %v317_v30, 0  ;;  %v1219_v36 = vperm.slane %v318_v31, 0  ;;  %v1221_v39 = vperm.slane %v427_v32, 1  ;;  %v1224_v42 = vperm.slane %v428_v35, 1 }
  0x14   : > { %v1228_v46 = vperm.slane %v497_v40, 2  ;;  %v1231_v49 = vperm.slane %v498_v43, 2 }
  0x15   : > { %376 = vperm.xlu1 %1094, %v259_v4   ;;  %313 = vperm.xlu0 %1093, %v251_v5  }
  0x17   : > { %424 = vperm.xlu2 %1095, %v251_v5  }
  0x1d   : > { %303 = vperm.xlu1 %1094, %v249_v6   ;;  %298 = vperm.xlu0 %1093, %v248_v7  }
  0x1f   : > { %1096 = vset.pattern.permute.xlu2 %v1123_v8 }
  0x20   : > { %490 = vperm.xlu2 %1096, %v250_v1  }
  0x25   : > { %361 = vperm.xlu1 %1094, %v256_v9   ;;  %288 = vperm.xlu0 %1093, %v246_v10  }
  0x28   : > { %1097 = vset.pattern.permute.xlu2 %v1121_v2 }
  0x29   : > { %366 = vperm.xlu2 %1097, %v257_v11  }
  0x2d   : > { %1098 = vset.pattern.permute.xlu1 %v1122_v3  ;;  %356 = vperm.xlu0 %1093, %v255_v12  }
  0x2e   : > { %412 = vperm.xlu1 %1098, %v248_v7  }
  0x31   : > { %1099 = vset.pattern.permute.xlu2 %v1122_v3 }
  0x32   : > { %416 = vperm.xlu2 %1099, %v249_v6  }
  0x35   : > { %278 = vperm.xlu0 %1093, %v244_v13  }
  0x36   : > { %1100 = vset.pattern.permute.xlu1 %v1121_v2 }
  0x37   : > { %293 = vperm.xlu1 %1100, %v247_v14  }
  0x3a   : > { %1101 = vset.pattern.permute.xlu2 %v1123_v8 }
  0x3b   : > { %482 = vperm.xlu2 %1101, %v248_v7  }
  0x3d   : > { %1106 = vset.pattern.permute.xlu0 %v1123_v8 }
  0x3e   : > { %494 = vperm.xlu0 %1106, %v251_v5  }
  0x3f   : > { %1102 = vset.pattern.permute.xlu1 %v1123_v8 }
  0x40   : > { %486 = vperm.xlu1 %1102, %v249_v6  }
  0x43   : > { %1103 = vset.pattern.permute.xlu2 %v1121_v2 }
  0x44   : > { %351 = vperm.xlu2 %1103, %v254_v15  }
  0x46   : > { %478 = vperm.xlu0 %1106, %v247_v14  }
  0x48   : > { %1104 = vset.pattern.permute.xlu1 %v1122_v3 }
  0x49   : > { %404 = vperm.xlu1 %1104, %v246_v10  }
  0x4c   : > { %1105 = vset.pattern.permute.xlu2 %v1122_v3 }
  0x4d   : > { %408 = vperm.xlu2 %1105, %v247_v14  }
  0x4e   : > { %466 = vperm.xlu0 %1106, %v244_v13  }
  0x51   : > { %1107 = vset.pattern.permute.xlu1 %v1121_v2 }
  0x52   : > { %283 = vperm.xlu1 %1107, %v245_v16  }
  0x55   : > { %1108 = vset.pattern.permute.xlu2 %v1123_v8 }
  0x56   : > { %474 = vperm.xlu2 %1108, %v246_v10  }
  0x5a   : > { %341 = vperm.xlu1 %1107, %v252_v17  }
  0x5e   : > { %1109 = vset.pattern.permute.xlu2 %v1121_v2 }
  0x5f   : > { %346 = vperm.xlu2 %1109, %v253_v18  }
  0x62   : > { %1110 = vset.pattern.permute.xlu1 %v1122_v3 }
  0x63   : > { %396 = vperm.xlu1 %1110, %v244_v13  }
  0x67   : > { %1111 = vset.pattern.permute.xlu2 %v1122_v3 }
  0x68   : > { %400 = vperm.xlu2 %1111, %v245_v16  }
  0x69   : > { %v421_v19 = vpop.permute.xlu2 %420 }
  0x6a   : > { %v445_v45 = vmul.f32 %v1221_v39, %v421_v19  ;;  %v446_v48 = vmul.f32 %v1224_v42, %v421_v19 }
  0x6b   : > { %1112 = vset.pattern.permute.xlu1 %v1123_v8 }
  0x6c   : > { %470 = vperm.xlu1 %1112, %v245_v16  }
  0x71   : > { %v1210_v20 = vpop.permute.xlu2 %424 }
  0x72   : > { %v448_v27 = vmul.f32 %v1224_v42, %v1210_v20 }
  0x7a   : > { %v491_v23 = vpop.permute.xlu2 %490 }
  0x7b   : > { %v515_v54 = vmul.f32 %v1228_v46, %v491_v23  ;;  %v516_v56 = vmul.f32 %v1231_v49, %v491_v23  ;;  %v447_v23 = vmul.f32 %v1221_v39, %v1210_v20 }
  0x7f   : > { %v372_v21 = vpop.permute.xlu1 %371  ;;  %v309_v22 = vpop.permute.xlu0 %308 }
  0x80   : > { %v335_v41 = vmul.f32 %v1217_v33, %v309_v22  ;;  %v336_v44 = vmul.f32 %v1219_v36, %v309_v22 }
  0x82   : > { %v391_v47 = vadd.f32 %v372_v21, %v335_v41  ;;  %v392_v50 = vadd.f32 %v372_v21, %v336_v44 }
  0x83   : > { %v367_v26 = vpop.permute.xlu2 %366 }
  0x84   : > { %v461_v55 = vadd.f32 %v445_v45, %v391_v47  ;;  %v462_v57 = vadd.f32 %v446_v48, %v392_v50 }
  0x86   : > { %v531_v61 = vadd.f32 %v515_v54, %v461_v55  ;;  %v532_v0 = vadd.f32 %v516_v56, %v462_v57 }
  0x87   : > { %v377_v24 = vpop.permute.xlu1 %376  ;;  %v314_v25 = vpop.permute.xlu0 %313 }
  0x88   : > { %v337_v1 = vmul.f32 %v1217_v33, %v314_v25  ;;  %v338_v2 = vmul.f32 %v1219_v36, %v314_v25  ;;  %vm547_vm0 = vcmp.ge.f32.partialorder %v531_v61, 0.0  ;;  %v563_v13 = vmul.f32 0.2, %v531_v61 }
  0x89   : > { %vm548_vm1 = vcmp.ge.f32.partialorder %v532_v0, 0.0  ;;  %v564_v17 = vmul.f32 0.2, %v532_v0 }
  0x8a   : > { %v393_v14 = vadd.f32 %v377_v24, %v337_v1  ;;  %v394_v15 = vadd.f32 %v377_v24, %v338_v2  ;;  %v579_v30 = vsel %vm547_vm0, %v531_v61, %v563_v13  ;;  %vm631_vm0 = vcmask 523264  }
  0x8b   : > { %v580_v31 = vsel %vm548_vm1, %v532_v0, %v564_v17  ;;  %vm802_vm1 = vcmask 7168  }
  0x8c   : > { %v417_v34 = vpop.permute.xlu2 %416  ;;  %v463_v24 = vadd.f32 %v447_v23, %v393_v14 }
  0x8d   : > { %v443_v16 = vmul.f32 %v1221_v39, %v417_v34  ;;  %v444_v18 = vmul.f32 %v1224_v42, %v417_v34  ;;  %v464_v34 = vadd.f32 %v448_v27, %v394_v15 }
  0x8f   : > { %v304_v28 = vpop.permute.xlu1 %303  ;;  %v299_v29 = vpop.permute.xlu0 %298 }
  0x90   : > { %v331_v58 = vmul.f32 %v1217_v33, %v299_v29  ;;  %v332_v59 = vmul.f32 %v1219_v36, %v299_v29  ;;  %v333_v3 = vmul.f32 %v1217_v33, %v304_v28  ;;  %v334_v5 = vmul.f32 %v1219_v36, %v304_v28 }
  0x92   : > { %v389_v19 = vadd.f32 %v367_v26, %v333_v3  ;;  %v390_v21 = vadd.f32 %v367_v26, %v334_v5 }
  0x94   : > { %v459_v26 = vadd.f32 %v443_v16, %v389_v19  ;;  %v460_v35 = vadd.f32 %v444_v18, %v390_v21 }
  0x95   : > { %v483_v51 = vpop.permute.xlu2 %482 }
  0x96   : > { %v511_v7 = vmul.f32 %v1228_v46, %v483_v51  ;;  %v512_v11 = vmul.f32 %v1231_v49, %v483_v51 }
  0x97   : > { %v362_v37 = vpop.permute.xlu1 %361  ;;  %v289_v38 = vpop.permute.xlu0 %288 }
  0x98   : > { %v387_v62 = vadd.f32 %v362_v37, %v331_v58  ;;  %v388_v6 = vadd.f32 %v362_v37, %v332_v59  ;;  %v327_v25 = vmul.f32 %v1217_v33, %v289_v38  ;;  %v328_v28 = vmul.f32 %v1219_v36, %v289_v38 }
  0x9e   : > { %v352_v9 = vpop.permute.xlu2 %351 }
  0x9f   : > { %v1233_v52 = vpop.permute.xlu0 %356  ;;  %v383_v40 = vadd.f32 %v352_v9, %v327_v25  ;;  %v384_v20 = vadd.f32 %v352_v9, %v328_v28 }
  0xa0   : > { %v413_v53 = vpop.permute.xlu1 %412 }
  0xa1   : > { %v441_v60 = vmul.f32 %v1221_v39, %v413_v53  ;;  %v442_v63 = vmul.f32 %v1224_v42, %v413_v53 }
  0xa3   : > { %v457_v8 = vadd.f32 %v441_v60, %v387_v62  ;;  %v458_v12 = vadd.f32 %v442_v63, %v388_v6 }
  0xa5   : > { %v527_v22 = vadd.f32 %v511_v7, %v457_v8  ;;  %v528_v29 = vadd.f32 %v512_v11, %v458_v12 }
  0xa7   : > { %v1244_v4 = vpop.permute.xlu0 %278  ;;  %v559_v37 = vmul.f32 0.2, %v527_v22  ;;  %v409_v41 = vpop.permute.xlu2 %408  ;;  %vm543_vm2 = vcmp.ge.f32.partialorder %v527_v22, 0.0  ;;  %vm544_vm3 = vcmp.ge.f32.partialorder %v528_v29, 0.0  ;;  %v560_v57 = vmul.f32 0.2, %v528_v29 }
  0xa8   : > { %v439_v54 = vmul.f32 %v1221_v39, %v409_v41  ;;  %v440_v55 = vmul.f32 %v1224_v42, %v409_v41 }
  0xa9   : > { %v294_v10 = vpop.permute.xlu1 %293  ;;  %v575_v56 = vsel %vm543_vm2, %v527_v22, %v559_v37  ;;  %v576_v7 = vsel %vm544_vm3, %v528_v29, %v560_v57 }
  0xaa   : > { %v329_v38 = vmul.f32 %v1217_v33, %v294_v10  ;;  %v330_v45 = vmul.f32 %v1219_v36, %v294_v10 }
  0xac   : > { %v385_v61 = vadd.f32 %v1233_v52, %v329_v38  ;;  %v386_v62 = vadd.f32 %v1233_v52, %v330_v45  ;;  %v323_v45 = vmul.f32 %v1217_v33, %v1244_v4 }
  0xae   : > { %v455_v12 = vadd.f32 %v439_v54, %v385_v61  ;;  %v456_v52 = vadd.f32 %v440_v55, %v386_v62 }
  0xb0   : > { %v495_v32 = vpop.permute.xlu0 %494  ;;  %v475_v13 = vpop.permute.xlu2 %474 }
  0xb1   : > { %v517_v43 = vmul.f32 %v1228_v46, %v495_v32  ;;  %v518_v44 = vmul.f32 %v1231_v49, %v495_v32  ;;  %v507_v15 = vmul.f32 %v1228_v46, %v475_v13  ;;  %v508_v16 = vmul.f32 %v1231_v49, %v475_v13 }
  0xb2   : > { %v487_v47 = vpop.permute.xlu1 %486 }
  0xb3   : > { %v533_v48 = vadd.f32 %v517_v43, %v463_v24  ;;  %v534_v50 = vadd.f32 %v518_v44, %v464_v34  ;;  %v513_v51 = vmul.f32 %v1228_v46, %v487_v47  ;;  %v514_v53 = vmul.f32 %v1231_v49, %v487_v47 }
  0xb4   : > { %v324_v47 = vmul.f32 %v1219_v36, %v1244_v4 }
  0xb5   : > { %v529_v58 = vadd.f32 %v513_v51, %v459_v26  ;;  %v530_v59 = vadd.f32 %v514_v53, %v460_v35  ;;  %vm549_vm4 = vcmp.ge.f32.partialorder %v533_v48, 0.0  ;;  %v565_v60 = vmul.f32 0.2, %v533_v48 }
  0xb6   : > { %vm550_vm5 = vcmp.ge.f32.partialorder %v534_v50, 0.0  ;;  %v566_v63 = vmul.f32 0.2, %v534_v50 }
  0xb7   : > { %v581_v0 = vsel %vm549_vm4, %v533_v48, %v565_v60  ;;  %vm545_vm6 = vcmp.ge.f32.partialorder %v529_v58, 0.0  ;;  %v561_v1 = vmul.f32 0.2, %v529_v58  ;;  %vm546_vm7 = vcmp.ge.f32.partialorder %v530_v59, 0.0 }
  0xb8   : > { %v479_v2 = vpop.permute.xlu0 %478  ;;  %v589_v3 = vpack.c.bf16 %v581_v0, %v579_v30  ;;  %v582_v5 = vsel %vm550_vm5, %v534_v50, %v566_v63  ;;  %v562_v6 = vmul.f32 0.2, %v530_v59 }
  0xb9   : > { %v509_v8 = vmul.f32 %v1228_v46, %v479_v2  ;;  %v510_v9 = vmul.f32 %v1231_v49, %v479_v2  ;;  %v590_v10 = vpack.c.bf16 %v582_v5, %v580_v31  ;;  %v577_v11 = vsel %vm545_vm6, %v529_v58, %v561_v1  ;;  %v347_v38 = vpop.permute.xlu2 %346 }
  0xba   : > { %660 = vmatpush.bf16.msra.mxu0 %v589_v3  ;;  %1074 = vmatpush.bf16.msra.mxu2 %v589_v3  ;;  %v578_v14 = vsel %vm546_vm7, %v530_v59, %v562_v6  ;;  %v587_v18 = vpack.c.bf16 %v577_v11, %v575_v56 }
  0xbb   : > { %709 = vmatpush.bf16.msra.mxu1 %v590_v10  ;;  %1078 = vmatpush.bf16.msra.mxu3 %v590_v10  ;;  %v405_v17 = vpop.permute.xlu1 %404  ;;  %v525_v19 = vadd.f32 %v509_v8, %v455_v12  ;;  %v526_v21 = vadd.f32 %v510_v9, %v456_v52  ;;  %v588_v25 = vpack.c.bf16 %v578_v14, %v576_v7 }
  0xbc   : > { %v437_v22 = vmul.f32 %v1221_v39, %v405_v17  ;;  %v438_v23 = vmul.f32 %v1224_v42, %v405_v17  ;;  %v1067_v17 = vld [vmem:[%s1412_s3 + $0x8] sm:$0xff] }
  0xbd   : > { %v557_v30 = vmul.f32 0.2, %v525_v19  ;;  %v558_v31 = vmul.f32 0.2, %v526_v21  ;;  %vm541_vm8 = vcmp.ge.f32.partialorder %v525_v19, 0.0  ;;  %vm542_vm9 = vcmp.ge.f32.partialorder %v526_v21, 0.0 }
  0xbe   : > { %v453_v27 = vadd.f32 %v437_v22, %v383_v40  ;;  %v454_v28 = vadd.f32 %v438_v23, %v384_v20  ;;  %661 = vmatpush.bf16.msra.mxu0 %v587_v18  ;;  %1075 = vmatpush.bf16.msra.mxu2 %v587_v18  ;;  %v1071_v18 = vld [vmem:[%s1412_s3 + $0x28] sm:$0xff]  ;;  %v1073_v22 = vld [vmem:[%s1412_s3 + $0x38] sm:$0xff] }
  0xbf   : > { %710 = vmatpush.bf16.msra.mxu1 %v588_v25  ;;  %1079 = vmatpush.bf16.msra.mxu3 %v588_v25  ;;  %v573_v37 = vsel %vm541_vm8, %v525_v19, %v557_v30  ;;  %v574_v40 = vsel %vm542_vm9, %v526_v21, %v558_v31  ;;  %v1068_v19 = vld [vmem:[%s1412_s3 + $0x10] sm:$0xff]  ;;  %v1069_v23 = vld [vmem:[%s1412_s3 + $0x18] sm:$0xff] }
  0xc0   : > { %v523_v29 = vadd.f32 %v507_v15, %v453_v27  ;;  %v524_v24 = vadd.f32 %v508_v16, %v454_v28  ;;  %v467_v57 = vpop.permute.xlu0 %466  ;;  %v1072_v21 = vld [vmem:[%s1412_s3 + $0x30] sm:$0xff] }
  0xc1   : > { %v503_v61 = vmul.f32 %v1228_v46, %v467_v57  ;;  %v504_v62 = vmul.f32 %v1231_v49, %v467_v57 }
  0xc2   : > { %vm539_vm10 = vcmp.ge.f32.partialorder %v523_v29, 0.0  ;;  %v555_v32 = vmul.f32 0.2, %v523_v29  ;;  %vm540_vm11 = vcmp.ge.f32.partialorder %v524_v24, 0.0  ;;  %v556_v34 = vmul.f32 0.2, %v524_v24  ;;  %v401_v58 = vpop.permute.xlu2 %400 }
  0xc3   : > { %v435_v0 = vmul.f32 %v1221_v39, %v401_v58  ;;  %v436_v1 = vmul.f32 %v1224_v42, %v401_v58 }
  0xc4   : > { %v284_v26 = vpop.permute.xlu1 %283  ;;  %v571_v35 = vsel %vm539_vm10, %v523_v29, %v555_v32  ;;  %v572_v41 = vsel %vm540_vm11, %v524_v24, %v556_v34 }
  0xc5   : > { %v585_v43 = vpack.c.bf16 %v573_v37, %v571_v35  ;;  %v586_v44 = vpack.c.bf16 %v574_v40, %v572_v41  ;;  %v325_v53 = vmul.f32 %v1217_v33, %v284_v26  ;;  %v326_v54 = vmul.f32 %v1219_v36, %v284_v26 }
  0xc7   : > { %662 = vmatpush.bf16.msra.mxu0 %v585_v43  ;;  %1076 = vmatpush.bf16.msra.mxu2 %v585_v43  ;;  %v381_v4 = vadd.f32 %v347_v38, %v325_v53  ;;  %v382_v63 = vadd.f32 %v347_v38, %v326_v54 }
  0xc8   : > { %711 = vmatpush.bf16.msra.mxu1 %v586_v44  ;;  %1080 = vmatpush.bf16.msra.mxu3 %v586_v44 }
  0xc9   : > { %v451_v36 = vadd.f32 %v435_v0, %v381_v4  ;;  %v452_v5 = vadd.f32 %v436_v1, %v382_v63 }
  0xcc   : > { %v342_v20 = vpop.permute.xlu1 %341 }
  0xcd   : > { %v379_v55 = vadd.f32 %v342_v20, %v323_v45  ;;  %v380_v56 = vadd.f32 %v342_v20, %v324_v47 }
  0xd5   : > { %v397_v48 = vpop.permute.xlu1 %396 }
  0xd6   : > { %v433_v50 = vmul.f32 %v1221_v39, %v397_v48  ;;  %v434_v51 = vmul.f32 %v1224_v42, %v397_v48 }
  0xd8   : > { %v449_v59 = vadd.f32 %v433_v50, %v379_v55  ;;  %v450_v60 = vadd.f32 %v434_v51, %v380_v56 }
  0xda   : > { %v519_v2 = vadd.f32 %v503_v61, %v449_v59  ;;  %v520_v33 = vadd.f32 %v504_v62, %v450_v60 }
  0xdc   : > { %v551_v10 = vmul.f32 0.2, %v519_v2  ;;  %v552_v11 = vmul.f32 0.2, %v520_v33  ;;  %vm535_vm12 = vcmp.ge.f32.partialorder %v519_v2, 0.0  ;;  %vm536_vm13 = vcmp.ge.f32.partialorder %v520_v33, 0.0 }
  0xde   : > { %v471_v3 = vpop.permute.xlu1 %470  ;;  %v567_v42 = vsel %vm535_vm12, %v519_v2, %v551_v10  ;;  %v568_v13 = vsel %vm536_vm13, %v520_v33, %v552_v11 }
  0xdf   : > { %v505_v6 = vmul.f32 %v1228_v46, %v471_v3  ;;  %v506_v7 = vmul.f32 %v1231_v49, %v471_v3  ;;  %v1066_v46 = vld [vmem:[%s1412_s3] sm:$0xff] }
  0xe0   : > { %v1070_v49 = vld [vmem:[%s1412_s3 + $0x20] sm:$0xff] }
  0xe1   : > { %v521_v8 = vadd.f32 %v505_v6, %v451_v36  ;;  %v522_v9 = vadd.f32 %v506_v7, %v452_v5 }
  0xe3   : > { %vm537_vm14 = vcmp.ge.f32.partialorder %v521_v8, 0.0  ;;  %v553_v12 = vmul.f32 0.2, %v521_v8  ;;  %vm538_vm15 = vcmp.ge.f32.partialorder %v522_v9, 0.0  ;;  %v554_v39 = vmul.f32 0.2, %v522_v9 }
  0xe5   : > { %v569_v52 = vsel %vm537_vm14, %v521_v8, %v553_v12  ;;  %v570_v14 = vsel %vm538_vm15, %v522_v9, %v554_v39 }
  0xe6   : > { %v583_v15 = vpack.c.bf16 %v569_v52, %v567_v42  ;;  %v584_v16 = vpack.c.bf16 %v570_v14, %v568_v13 }
  0xe8   : > { %663 = vmatpush.bf16.msra.mxu0 %v583_v15  ;;  %1077 = vmatpush.bf16.msra.mxu2 %v583_v15 }
  0xe9   : > { %712 = vmatpush.bf16.msra.mxu1 %v584_v16  ;;  %1081 = vmatpush.bf16.msra.mxu3 %v584_v16 }
  0xeb   : > { %1048 = vmatmul.msk.bf16.vlgmr.msra.gmra.mxu0 %vm631_vm0, %v1066_v46  ;;  %1052 = vmatmul.msk.bf16.vlgmr.msra.gmra.mxu2 %vm631_vm0, %v1070_v49 }
  0xec   : > { %1056 = vmatmul.msk.bf16.vlgmr.msra.gmra.mxu1 %vm631_vm0, %v1066_v46  ;;  %1060 = vmatmul.msk.bf16.vlgmr.msra.gmra.mxu3 %vm631_vm0, %v1070_v49 }
  0xfb   : > { %1049 = vmatmul.msk.bf16.gmra.mxu0 %vm631_vm0, %v1067_v17  ;;  %1053 = vmatmul.msk.bf16.gmra.mxu2 %vm631_vm0, %v1071_v18 }
  0xfc   : > { %1057 = vmatmul.msk.bf16.gmra.mxu1 %vm631_vm0, %v1067_v17  ;;  %1061 = vmatmul.msk.bf16.gmra.mxu3 %vm631_vm0, %v1071_v18 }
 0x10b   : > { %1050 = vmatmul.msk.bf16.gmra.mxu0 %vm631_vm0, %v1068_v19  ;;  %1054 = vmatmul.msk.bf16.gmra.mxu2 %vm631_vm0, %v1072_v21 }
 0x10c   : > { %1058 = vmatmul.msk.bf16.gmra.mxu1 %vm631_vm0, %v1068_v19  ;;  %1062 = vmatmul.msk.bf16.gmra.mxu3 %vm631_vm0, %v1072_v21 }
 0x11b   : > { %1055 = vmatmul.msk.bf16.gmra.mxu2 %vm631_vm0, %v1073_v22  ;;  %1051 = vmatmul.msk.bf16.gmra.mxu0 %vm631_vm0, %v1069_v23 }
 0x11c   : > { %1063 = vmatmul.msk.bf16.gmra.mxu3 %vm631_vm0, %v1073_v22  ;;  %1059 = vmatmul.msk.bf16.gmra.mxu1 %vm631_vm0, %v1069_v23 }
 0x168   : > { %v665_v25 = vpop.f32.mrf.mxu0 }
 0x169   : > { %v714_v27 = vpop.f32.mrf.mxu1  ;;  %v819_v29 = vmul.f32 %v665_v25, %v665_v25 }
 0x16a   : > { %v754_v28 = vadd.f32 %v714_v27, %v665_v25  ;;  %v820_v24 = vmul.f32 %v714_v27, %v714_v27 }
 0x16c   : > { %755 = vadd.xlane.f32.xlu2 %v754_v28  ;;  %v851_v40 = vadd.f32 %v820_v24, %v819_v29 }
 0x16e   : > { %v685_v30 = vpop.f32.mrf.mxu2 }
 0x16f   : > { %v835_v31 = vmul.f32 %v685_v30, %v685_v30  ;;  %v734_v32 = vpop.f32.mrf.mxu3 }
 0x170   : > { %v836_v34 = vmul.f32 %v734_v32, %v734_v32  ;;  %v667_v26 = vpop.f32.mrf.mxu0  ;;  %v778_v35 = vadd.f32 %v734_v32, %v685_v30 }
 0x171   : > { %v716_v37 = vpop.f32.mrf.mxu1  ;;  %v821_v53 = vmul.f32 %v667_v26, %v667_v26 }
 0x172   : > { %779 = vadd.xlane.f32.xlu0 %v778_v35  ;;  %v875_v41 = vadd.f32 %v836_v34, %v835_v31  ;;  %v757_v45 = vadd.f32 %v716_v37, %v667_v26  ;;  %v822_v54 = vmul.f32 %v716_v37, %v716_v37 }
 0x174   : > { %876 = vadd.xlane.f32.xlu1 %v875_v41  ;;  %852 = vadd.xlane.f32.xlu2 %v851_v40  ;;  %v854_v57 = vadd.f32 %v822_v54, %v821_v53 }
 0x176   : > { %v687_v43 = vpop.f32.mrf.mxu2 }
 0x177   : > { %v837_v44 = vmul.f32 %v687_v43, %v687_v43  ;;  %v736_v20 = vpop.f32.mrf.mxu3 }
 0x178   : > { %v838_v38 = vmul.f32 %v736_v20, %v736_v20  ;;  %v670_v47 = vpop.f32.mrf.mxu0  ;;  %v781_v50 = vadd.f32 %v736_v20, %v687_v43 }
 0x179   : > { %v719_v48 = vpop.f32.mrf.mxu1  ;;  %v823_v63 = vmul.f32 %v670_v47, %v670_v47 }
 0x17a   : > { %758 = vadd.xlane.f32.xlu0 %v757_v45  ;;  %v878_v51 = vadd.f32 %v838_v38, %v837_v44  ;;  %v760_v59 = vadd.f32 %v719_v48, %v670_v47  ;;  %v824_v0 = vmul.f32 %v719_v48, %v719_v48 }
 0x17c   : > { %782 = vadd.xlane.f32.xlu1 %v781_v50  ;;  %879 = vadd.xlane.f32.xlu2 %v878_v51  ;;  %v857_v3 = vadd.f32 %v824_v0, %v823_v63 }
 0x17e   : > { %v690_v55 = vpop.f32.mrf.mxu2 }
 0x17f   : > { %v739_v56 = vpop.f32.mrf.mxu3  ;;  %v839_v62 = vmul.f32 %v690_v55, %v690_v55 }
 0x180   : > { %v784_v58 = vadd.f32 %v739_v56, %v690_v55  ;;  %v672_v60 = vpop.f32.mrf.mxu0  ;;  %v840_v4 = vmul.f32 %v739_v56, %v739_v56 }
 0x181   : > { %v721_v61 = vpop.f32.mrf.mxu1  ;;  %v825_v7 = vmul.f32 %v672_v60, %v672_v60 }
 0x182   : > { %855 = vadd.xlane.f32.xlu0 %v854_v57  ;;  %v881_v33 = vadd.f32 %v840_v4, %v839_v62  ;;  %v763_v36 = vadd.f32 %v721_v61, %v672_v60  ;;  %v826_v8 = vmul.f32 %v721_v61, %v721_v61 }
 0x184   : > { %785 = vadd.xlane.f32.xlu2 %v784_v58  ;;  %761 = vadd.xlane.f32.xlu1 %v760_v59  ;;  %v860_v14 = vadd.f32 %v826_v8, %v825_v7 }
 0x186   : > { %v692_v1 = vpop.f32.mrf.mxu2 }
 0x187   : > { %v741_v2 = vpop.f32.mrf.mxu3  ;;  %v841_v9 = vmul.f32 %v692_v1, %v692_v1 }
 0x188   : > { %v675_v5 = vpop.f32.mrf.mxu0  ;;  %v842_v10 = vmul.f32 %v741_v2, %v741_v2  ;;  %v787_v39 = vadd.f32 %v741_v2, %v692_v1 }
 0x189   : > { %v724_v6 = vpop.f32.mrf.mxu1  ;;  %v827_v42 = vmul.f32 %v675_v5, %v675_v5 }
 0x18a   : > { %882 = vadd.xlane.f32.xlu0 %v881_v33  ;;  %v828_v52 = vmul.f32 %v724_v6, %v724_v6  ;;  %v884_v13 = vadd.f32 %v842_v10, %v841_v9  ;;  %v766_v17 = vadd.f32 %v724_v6, %v675_v5 }
 0x18c   : > { %858 = vadd.xlane.f32.xlu1 %v857_v3  ;;  %764 = vadd.xlane.f32.xlu2 %v763_v36  ;;  %v863_v46 = vadd.f32 %v828_v52, %v827_v42 }
 0x18e   : > { %v695_v11 = vpop.f32.mrf.mxu2 }
 0x18f   : > { %v744_v12 = vpop.f32.mrf.mxu3  ;;  %v843_v21 = vmul.f32 %v695_v11, %v695_v11 }
 0x190   : > { %v677_v15 = vpop.f32.mrf.mxu0  ;;  %v790_v49 = vadd.f32 %v744_v12, %v695_v11  ;;  %v844_v22 = vmul.f32 %v744_v12, %v744_v12 }
 0x191   : > { %v726_v16 = vpop.f32.mrf.mxu1  ;;  %v829_v27 = vmul.f32 %v677_v15, %v677_v15 }
 0x192   : > { %788 = vadd.xlane.f32.xlu0 %v787_v39  ;;  %v830_v28 = vmul.f32 %v726_v16, %v726_v16  ;;  %v769_v29 = vadd.f32 %v726_v16, %v677_v15  ;;  %v887_v24 = vadd.f32 %v844_v22, %v843_v21 }
 0x194   : > { %885 = vadd.xlane.f32.xlu1 %v884_v13  ;;  %861 = vadd.xlane.f32.xlu2 %v860_v14  ;;  %v866_v30 = vadd.f32 %v830_v28, %v829_v27 }
 0x196   : > { %v697_v18 = vpop.f32.mrf.mxu2 }
 0x197   : > { %v746_v19 = vpop.f32.mrf.mxu3  ;;  %v845_v51 = vmul.f32 %v697_v18, %v697_v18 }
 0x198   : > { %v680_v23 = vpop.f32.mrf.mxu0  ;;  %v793_v41 = vadd.f32 %v746_v19, %v697_v18  ;;  %v846_v53 = vmul.f32 %v746_v19, %v746_v19 }
 0x199   : > { %v729_v25 = vpop.f32.mrf.mxu1  ;;  %v831_v44 = vmul.f32 %v680_v23, %v680_v23 }
 0x19a   : > { %864 = vadd.xlane.f32.xlu0 %v863_v46  ;;  %v772_v37 = vadd.f32 %v729_v25, %v680_v23  ;;  %v832_v20 = vmul.f32 %v729_v25, %v729_v25  ;;  %v890_v56 = vadd.f32 %v846_v53, %v845_v51 }
 0x19c   : > { %791 = vadd.xlane.f32.xlu1 %v790_v49  ;;  %767 = vadd.xlane.f32.xlu2 %v766_v17  ;;  %v869_v50 = vadd.f32 %v832_v20, %v831_v44 }
 0x19e   : > { %v700_v31 = vpop.f32.mrf.mxu2 }
 0x19f   : > { %v749_v32 = vpop.f32.mrf.mxu3  ;;  %v847_v54 = vmul.f32 %v700_v31, %v700_v31 }
 0x1a0   : > { %v796_v34 = vadd.f32 %v749_v32, %v700_v31  ;;  %v682_v26 = vpop.f32.mrf.mxu0  ;;  %v848_v55 = vmul.f32 %v749_v32, %v749_v32 }
 0x1a1   : > { %v731_v35 = vpop.f32.mrf.mxu1  ;;  %v833_v40 = vmul.f32 %v682_v26, %v682_v26 }
 0x1a2   : > { %770 = vadd.xlane.f32.xlu0 %v769_v29  ;;  %v834_v43 = vmul.f32 %v731_v35, %v731_v35  ;;  %v775_v57 = vadd.f32 %v731_v35, %v682_v26  ;;  %v893_v58 = vadd.f32 %v848_v55, %v847_v54 }
 0x1a4   : > { %888 = vadd.xlane.f32.xlu2 %v887_v24  ;;  %867 = vadd.xlane.f32.xlu1 %v866_v30  ;;  %v872_v47 = vadd.f32 %v834_v43, %v833_v40 }
 0x1a6   : > { %v702_v38 = vpop.f32.mrf.mxu2 }
 0x1a7   : > { %v751_v45 = vpop.f32.mrf.mxu3  ;;  %v849_v59 = vmul.f32 %v702_v38, %v702_v38 }
 0x1a8   : > { %v799_v48 = vadd.f32 %v751_v45, %v702_v38  ;;  %v850_v60 = vmul.f32 %v751_v45, %v751_v45 }
 0x1aa   : > { %797 = vadd.xlane.f32.xlu0 %v796_v34  ;;  %v896_v61 = vadd.f32 %v850_v60, %v849_v59 }
 0x1ac   : > { %794 = vadd.xlane.f32.xlu2 %v793_v41  ;;  %773 = vadd.xlane.f32.xlu1 %v772_v37 }
 0x1b2   : > { %873 = vadd.xlane.f32.xlu0 %v872_v47 }
 0x1b4   : > { %870 = vadd.xlane.f32.xlu2 %v869_v50  ;;  %800 = vadd.xlane.f32.xlu1 %v799_v48 }
 0x1ba   : > { %891 = vadd.xlane.f32.xlu0 %v890_v56 }
 0x1bc   : > { %894 = vadd.xlane.f32.xlu1 %v893_v58  ;;  %776 = vadd.xlane.f32.xlu2 %v775_v57 }
 0x1c4   : > { %897 = vadd.xlane.f32.xlu2 %v896_v61 }
 0x1df   : > { %v756_v62 = vpop.xlane.xlu2 %755 }
 0x1e0   : > { %803 = vst.msk [vmem:[%s1335_s6] sm:$0xff] %vm802_vm1, %v756_v62 }
 0x1e5   : > { %v780_v4 = vpop.xlane.xlu0 %779 }
 0x1e6   : > { %811 = vst.msk [vmem:[%s1335_s6 + $0x40] sm:$0xff] %vm802_vm1, %v780_v4 }
 0x1e7   : > { %v877_v63 = vpop.xlane.xlu1 %876  ;;  %v853_v0 = vpop.xlane.xlu2 %852 }
 0x1e8   : > { %907 = vst.msk [vmem:[%s1342_s19 + $0x40] sm:$0xff] %vm802_vm1, %v877_v63 }
 0x1e9   : > { %899 = vst.msk [vmem:[%s1342_s19] sm:$0xff] %vm802_vm1, %v853_v0 }
 0x1ed   : > { %v759_v1 = vpop.xlane.xlu0 %758 }
 0x1ee   : > { %804 = vst.msk [vmem:[%s1335_s6 + $0x8] sm:$0xff] %vm802_vm1, %v759_v1 }
 0x1ef   : > { %v783_v2 = vpop.xlane.xlu1 %782  ;;  %v880_v33 = vpop.xlane.xlu2 %879 }
 0x1f0   : > { %812 = vst.msk [vmem:[%s1335_s6 + $0x48] sm:$0xff] %vm802_vm1, %v783_v2 }
 0x1f1   : > { %908 = vst.msk [vmem:[%s1342_s19 + $0x48] sm:$0xff] %vm802_vm1, %v880_v33 }
 0x1f5   : > { %v856_v3 = vpop.xlane.xlu0 %855 }
 0x1f6   : > { %900 = vst.msk [vmem:[%s1342_s19 + $0x8] sm:$0xff] %vm802_vm1, %v856_v3 }
 0x1f7   : > { %v786_v36 = vpop.xlane.xlu2 %785  ;;  %v762_v5 = vpop.xlane.xlu1 %761 }
 0x1f8   : > { %813 = vst.msk [vmem:[%s1335_s6 + $0x50] sm:$0xff] %vm802_vm1, %v786_v36 }
 0x1f9   : > { %805 = vst.msk [vmem:[%s1335_s6 + $0x10] sm:$0xff] %vm802_vm1, %v762_v5 }
 0x1fd   : > { %v883_v6 = vpop.xlane.xlu0 %882 }
 0x1fe   : > { %909 = vst.msk [vmem:[%s1342_s19 + $0x50] sm:$0xff] %vm802_vm1, %v883_v6 }
 0x1ff   : > { %v859_v7 = vpop.xlane.xlu1 %858  ;;  %v765_v8 = vpop.xlane.xlu2 %764 }
 0x200   : > { %901 = vst.msk [vmem:[%s1342_s19 + $0x10] sm:$0xff] %vm802_vm1, %v859_v7 }
 0x201   : > { %806 = vst.msk [vmem:[%s1335_s6 + $0x18] sm:$0xff] %vm802_vm1, %v765_v8 }
 0x205   : > { %v789_v9 = vpop.xlane.xlu0 %788 }
 0x206   : > { %814 = vst.msk [vmem:[%s1335_s6 + $0x58] sm:$0xff] %vm802_vm1, %v789_v9 }
 0x207   : > { %v886_v10 = vpop.xlane.xlu1 %885  ;;  %v862_v11 = vpop.xlane.xlu2 %861 }
 0x208   : > { %910 = vst.msk [vmem:[%s1342_s19 + $0x58] sm:$0xff] %vm802_vm1, %v886_v10 }
 0x209   : > { %902 = vst.msk [vmem:[%s1342_s19 + $0x18] sm:$0xff] %vm802_vm1, %v862_v11 }
 0x20d   : > { %v865_v12 = vpop.xlane.xlu0 %864 }
 0x20e   : > { %903 = vst.msk [vmem:[%s1342_s19 + $0x20] sm:$0xff] %vm802_vm1, %v865_v12 }
 0x20f   : > { %v792_v39 = vpop.xlane.xlu1 %791  ;;  %v768_v42 = vpop.xlane.xlu2 %767 }
 0x210   : > { %815 = vst.msk [vmem:[%s1335_s6 + $0x60] sm:$0xff] %vm802_vm1, %v792_v39 }
 0x211   : > { %807 = vst.msk [vmem:[%s1335_s6 + $0x20] sm:$0xff] %vm802_vm1, %v768_v42 }
 0x215   : > { %v771_v52 = vpop.xlane.xlu0 %770 }
 0x216   : > { %808 = vst.msk [vmem:[%s1335_s6 + $0x28] sm:$0xff] %vm802_vm1, %v771_v52 }
 0x217   : > { %v889_v13 = vpop.xlane.xlu2 %888  ;;  %v868_v14 = vpop.xlane.xlu1 %867 }
 0x218   : > { %911 = vst.msk [vmem:[%s1342_s19 + $0x60] sm:$0xff] %vm802_vm1, %v889_v13 }
 0x219   : > { %904 = vst.msk [vmem:[%s1342_s19 + $0x28] sm:$0xff] %vm802_vm1, %v868_v14 }
 0x21d   : > { %v798_v15 = vpop.xlane.xlu0 %797 }
 0x21e   : > { %817 = vst.msk [vmem:[%s1335_s6 + $0x70] sm:$0xff] %vm802_vm1, %v798_v15 }
 0x21f   : > { %v795_v16 = vpop.xlane.xlu2 %794  ;;  %v774_v46 = vpop.xlane.xlu1 %773 }
 0x220   : > { %816 = vst.msk [vmem:[%s1335_s6 + $0x68] sm:$0xff] %vm802_vm1, %v795_v16 }
 0x221   : > { %809 = vst.msk [vmem:[%s1335_s6 + $0x30] sm:$0xff] %vm802_vm1, %v774_v46 }
 0x225   : > { %v874_v49 = vpop.xlane.xlu0 %873 }
 0x226   : > { %906 = vst.msk [vmem:[%s1342_s19 + $0x38] sm:$0xff] %vm802_vm1, %v874_v49 }
 0x227   : > { %v871_v17 = vpop.xlane.xlu2 %870  ;;  %v801_v18 = vpop.xlane.xlu1 %800 }
 0x228   : > { %905 = vst.msk [vmem:[%s1342_s19 + $0x30] sm:$0xff] %vm802_vm1, %v871_v17 }
 0x229   : > { %818 = vst.msk [vmem:[%s1335_s6 + $0x78] sm:$0xff] %vm802_vm1, %v801_v18 }
 0x22d   : > { %v892_v19 = vpop.xlane.xlu0 %891 }
 0x22e   : > { %912 = vst.msk [vmem:[%s1342_s19 + $0x68] sm:$0xff] %vm802_vm1, %v892_v19 }
 0x22f   : > { %v895_v21 = vpop.xlane.xlu1 %894  ;;  %v777_v22 = vpop.xlane.xlu2 %776 }
 0x230   : > { %913 = vst.msk [vmem:[%s1342_s19 + $0x70] sm:$0xff] %vm802_vm1, %v895_v21 }
 0x231   : > { %810 = vst.msk [vmem:[%s1335_s6 + $0x38] sm:$0xff] %vm802_vm1, %v777_v22 }
 0x237   : > { %v898_v23 = vpop.xlane.xlu2 %897 }
 0x238   : > { %914 = vst.msk [vmem:[%s1342_s19 + $0x78] sm:$0xff] %vm802_vm1, %v898_v23 }
 0x239 PF: > { %s16_s18 = sadd.s32 1, %s1119_s18  }
 0x23a   : > { %p13_p5 = scmp.ge.s32.totalorder %s16_s18, 4  }
 0x23c   :  { %15 = sbr.rel (!%p13_p5) target bundleno = 1 (0x1), region = 78 }

</bundles_post_ra>
